<compile_context>
chip_gen: v7x
topology: tpu7x:2x2x1
jax: 0.10.0
libtpu: 0.0.40
codegen_flags: <defaults>
</compile_context>

<pallas_src>
import functools

import jax
import jax.numpy as jnp
from jax import lax
from jax.experimental import pallas as pl


# ------------------------------------------------------------ fused forward kernel
def _fused_autogcn_kernel(adj_ref, x_ref, w1_ref, b1_ref, w2_ref, b2_ref,
                          w3_ref, b3_ref, wl_ref, bl_ref, o_ref, *, kernel_type):
    N = adj_ref.shape[0]
    BN = x_ref.shape[0]
    B = BN // N
    h_last = w3_ref.shape[1]

    # ---- adjacency transform (kernel_a..kernel_e), fully in VMEM -------------
    a = adj_ref[...]                                      # (N, N)
    if kernel_type in ("a", "b"):
        adj_eff = a
    else:
        # A @ A.T without materializing the transpose: contract axis 1 of both.
        m = lax.dot_general(a, a, (((1,), (1,)), ((), ())),
                            preferred_element_type=jnp.float32)
        if kernel_type in ("d", "e"):
            row = lax.broadcasted_iota(jnp.int32, (N, N), 0)
            col = lax.broadcasted_iota(jnp.int32, (N, N), 1)
            m = m + (row == col).astype(jnp.float32)      # + I, no eye input
        if kernel_type == "e":                            # softmax over dim=1 (rows)
            m = m - jnp.max(m, axis=1, keepdims=True)
            e = jnp.exp(m)
            m = e / jnp.sum(e, axis=1, keepdims=True)
        adj_eff = m

    # ---- three GCN layers; activations never leave VMEM ----------------------
    h = x_ref[...]                                        # (B*N, Fin), batch-major rows
    for w_ref_l, b_ref_l in ((w1_ref, b1_ref), (w2_ref, b2_ref), (w3_ref, b3_ref)):
        w = w_ref_l[...]                                  # (Fin_l, Fout_l)
        bias = b_ref_l[...]                               # (N, Fout_l)
        # Batch folded into rows: one (B*N, Fin) @ (Fin, Fout) matmul.
        xw = jnp.dot(h, w, preferred_element_type=jnp.float32)     # (B*N, Fout)
        parts = []
        for b in range(B):                                # static unroll, B is tiny
            ax = jnp.dot(adj_eff, xw[b * N:(b + 1) * N, :],
                         preferred_element_type=jnp.float32)       # (N, Fout)
            parts.append(jnp.maximum(ax + bias, 0.0))
        h = jnp.concatenate(parts, axis=0)                # (B*N, Fout), sublane-aligned
        # TODO(synk): F.dropout(p, training=True) is stochastic; implemented as
        # identity here (cannot match torch's RNG stream bit-for-bit).

    # ---- flatten + nn.Linear, weight consumed as stored (out, in) ------------
    wl = wl_ref[...]                                      # (C, N*h_last)
    bl = bl_ref[...]                                      # (1, C)
    for b in range(B):
        hb = h[b * N:(b + 1) * N, :]                      # (N, h_last)
        acc = bl
        for n in range(N):                                # static unroll
            acc = acc + lax.dot_general(
                hb[n:n + 1, :],                           # (1, h_last)
                wl[:, n * h_last:(n + 1) * h_last],       # (C, h_last)
                (((1,), (1,)), ((), ())),                 # contract the 'in' axis
                preferred_element_type=jnp.float32)       # -> (1, C)
        o_ref[b:b + 1, :] = acc


# --------------------------------------------------------------------- wrapper
def auto_gcn_forward(params, x, kernel_type, dropout_p=0.0):
    del dropout_p  # identity dropout (see TODO in kernel)
    B, N, Fin = x.shape
    hid0 = params["w1"].shape[1]
    hid1 = params["w2"].shape[1]
    hid2 = params["w3"].shape[1]
    C = params["w_lin"].shape[0]

    x2d = x.reshape(B * N, Fin)                 # leading-dim reshape: free in XLA
    bl2d = params["b_lin"].reshape(1, C)

    def full(shp):
        return pl.BlockSpec(shp, lambda: (0,) * len(shp))

    kern = functools.partial(_fused_autogcn_kernel, kernel_type=kernel_type)
    return pl.pallas_call(
        kern,
        out_shape=jax.ShapeDtypeStruct((B, C), jnp.float32),
        in_specs=[
            full((N, N)),                       # adj
            full((B * N, Fin)),                 # x (batch folded into rows)
            full((Fin, hid0)), full((N, hid0)),
            full((hid0, hid1)), full((N, hid1)),
            full((hid1, hid2)), full((N, hid2)),
            full((C, hid2 * N)),                # w_lin as stored (out, in)
            full((1, C)),                       # b_lin
        ],
        out_specs=full((B, C)),
    )(params["adj"], x2d,
      params["w1"], params["b1"], params["w2"], params["b2"],
      params["w3"], params["b3"], params["w_lin"], bl2d)


# ---------------------------------------------------------------- plain-JAX ref
def auto_gcn_reference(params, x, kernel_type):
    adj = params["adj"]
    if kernel_type in ("c", "d", "e"):
        adj = adj @ adj.T
    if kernel_type in ("d", "e"):
        adj = adj + jnp.eye(adj.shape[0], dtype=adj.dtype)
    if kernel_type == "e":
        adj = jax.nn.softmax(adj, axis=1)
    h = x
    for w, b in ((params["w1"], params["b1"]),
                 (params["w2"], params["b2"]),
                 (params["w3"], params["b3"])):
        h = jax.nn.relu(jnp.einsum("nm,bmf->bnf", adj, h @ w) + b)
    hf = h.reshape(x.shape[0], -1)
    return hf @ params["w_lin"].T + params["b_lin"]


def init_params(key, in_features, n_nodes, num_classes, hidden_sizes):
    ks = jax.random.split(key, 9)
    h0, h1, h2 = hidden_sizes
    return {
        "adj": jax.random.normal(ks[0], (n_nodes, n_nodes), jnp.float32),
        "w1": jax.random.normal(ks[1], (in_features, h0), jnp.float32) * 0.1,
        "b1": jax.random.normal(ks[2], (n_nodes, h0), jnp.float32) * 0.1,
        "w2": jax.random.normal(ks[3], (h0, h1), jnp.float32) * 0.1,
        "b2": jax.random.normal(ks[4], (n_nodes, h1), jnp.float32) * 0.1,
        "w3": jax.random.normal(ks[5], (h1, h2), jnp.float32) * 0.1,
        "b3": jax.random.normal(ks[6], (n_nodes, h2), jnp.float32) * 0.1,
        "w_lin": jax.random.normal(ks[7], (num_classes, h2 * n_nodes), jnp.float32) * 0.1,
        "b_lin": jax.random.normal(ks[8], (num_classes,), jnp.float32) * 0.1,
    }


if __name__ == "__main__":
    key = jax.random.PRNGKey(0)
    B, N, Fin = 2, 8, 16
    hidden_sizes = (32, 32, 32)
    num_classes = 4
    kernel_type = "e"
    dropout_p = 0.0

    kx, kp = jax.random.split(key)
    x = jax.random.normal(kx, (B, N, Fin), jnp.float32)
    params = init_params(kp, Fin, N, num_classes, hidden_sizes)

    out = auto_gcn_forward(params, x, kernel_type, dropout_p)
    out = jax.block_until_ready(out)
    assert out.shape == (B, num_classes), out.shape

    ref = jax.block_until_ready(auto_gcn_reference(params, x, kernel_type))
    assert jnp.allclose(out, ref, rtol=1e-3, atol=1e-3), (out, ref)
    print("KERNEL_OK")
</pallas_src>

<mosaic_0001>
module attributes {stable_mosaic.version = 11 : i64} {
  func.func @_fused_autogcn_kernel(%arg0: memref<8x8xf32, #tpu.memory_space<vmem>>, %arg1: memref<16x16xf32, #tpu.memory_space<vmem>>, %arg2: memref<16x32xf32, #tpu.memory_space<vmem>>, %arg3: memref<8x32xf32, #tpu.memory_space<vmem>>, %arg4: memref<32x32xf32, #tpu.memory_space<vmem>>, %arg5: memref<8x32xf32, #tpu.memory_space<vmem>>, %arg6: memref<32x32xf32, #tpu.memory_space<vmem>>, %arg7: memref<8x32xf32, #tpu.memory_space<vmem>>, %arg8: memref<4x256xf32, #tpu.memory_space<vmem>>, %arg9: memref<1x4xf32, #tpu.memory_space<vmem>>, %arg10: memref<2x4xf32, #tpu.memory_space<vmem>>) attributes {dimension_semantics = [], scalar_prefetch = 0 : i64, scratch_operands = 0 : i64, tpu.core_type = #tpu.core_type<tc>} {
    %c0 = arith.constant 0 : index
    %c0_0 = arith.constant 0 : index
    %0 = vector.load %arg0[%c0, %c0_0] : memref<8x8xf32, #tpu.memory_space<vmem>>, vector<8x8xf32>
    %cst = arith.constant dense<0.000000e+00> : vector<8x8xf32>
    %1 = tpu.matmul %0, %0, %cst {dimension_numbers = #tpu.dot_dimension_numbers<[1], [1], [0], [0], [0, 0, 1, 0], [], []>} : vector<8x8xf32>, vector<8x8xf32>, vector<8x8xf32> -> vector<8x8xf32>
    %2 = tpu.iota {dimensions = array<i32: 0>} : vector<8x8xi32>
    %3 = tpu.iota {dimensions = array<i32: 1>} : vector<8x8xi32>
    %4 = arith.cmpi eq, %2, %3 : vector<8x8xi32>
    %5 = arith.extui %4 : vector<8x8xi1> to vector<8x8xi32>
    %6 = arith.sitofp %5 : vector<8x8xi32> to vector<8x8xf32>
    %7 = arith.addf %1, %6 : vector<8x8xf32>
    %cst_1 = arith.constant dense<0xFF800000> : vector<8xf32>
    %8 = vector.multi_reduction <maximumf>, %7, %cst_1 [1] : vector<8x8xf32> to vector<8xf32>
    %9 = vector.shape_cast %8 : vector<8xf32> to vector<8x1xf32>
    %10 = vector.broadcast %9 : vector<8x1xf32> to vector<8x8xf32>
    %11 = arith.subf %7, %10 : vector<8x8xf32>
    %12 = math.exp %11 : vector<8x8xf32>
    %cst_2 = arith.constant dense<0.000000e+00> : vector<8xf32>
    %13 = vector.multi_reduction <add>, %12, %cst_2 [1] : vector<8x8xf32> to vector<8xf32>
    %14 = vector.shape_cast %13 : vector<8xf32> to vector<8x1xf32>
    %15 = vector.broadcast %14 : vector<8x1xf32> to vector<8x8xf32>
    %16 = arith.divf %12, %15 : vector<8x8xf32>
    %c0_3 = arith.constant 0 : index
    %c0_4 = arith.constant 0 : index
    %17 = vector.load %arg1[%c0_3, %c0_4] : memref<16x16xf32, #tpu.memory_space<vmem>>, vector<16x16xf32>
    %c0_5 = arith.constant 0 : index
    %c0_6 = arith.constant 0 : index
    %18 = vector.load %arg2[%c0_5, %c0_6] : memref<16x32xf32, #tpu.memory_space<vmem>>, vector<16x32xf32>
    %c0_7 = arith.constant 0 : index
    %c0_8 = arith.constant 0 : index
    %19 = vector.load %arg3[%c0_7, %c0_8] : memref<8x32xf32, #tpu.memory_space<vmem>>, vector<8x32xf32>
    %cst_9 = arith.constant dense<0.000000e+00> : vector<16x32xf32>
    %20 = tpu.matmul %17, %18, %cst_9 {dimension_numbers = #tpu.dot_dimension_numbers<[1], [0], [0], [1], [0, 0, 1, 1], [], []>} : vector<16x16xf32>, vector<16x32xf32>, vector<16x32xf32> -> vector<16x32xf32>
    %21 = vector.extract_strided_slice %20 {offsets = [0, 0], sizes = [8, 32], strides = [1, 1]} : vector<16x32xf32> to vector<8x32xf32>
    %cst_10 = arith.constant dense<0.000000e+00> : vector<8x32xf32>
    %22 = tpu.matmul %16, %21, %cst_10 {dimension_numbers = #tpu.dot_dimension_numbers<[1], [0], [0], [1], [0, 0, 1, 1], [], []>} : vector<8x8xf32>, vector<8x32xf32>, vector<8x32xf32> -> vector<8x32xf32>
    %23 = arith.addf %22, %19 : vector<8x32xf32>
    %cst_11 = arith.constant 0.000000e+00 : f32
    %24 = vector.broadcast %cst_11 : f32 to vector<8x32xf32>
    %25 = arith.maximumf %23, %24 : vector<8x32xf32>
    %26 = vector.extract_strided_slice %20 {offsets = [8, 0], sizes = [8, 32], strides = [1, 1]} : vector<16x32xf32> to vector<8x32xf32>
    %cst_12 = arith.constant dense<0.000000e+00> : vector<8x32xf32>
    %27 = tpu.matmul %16, %26, %cst_12 {dimension_numbers = #tpu.dot_dimension_numbers<[1], [0], [0], [1], [0, 0, 1, 1], [], []>} : vector<8x8xf32>, vector<8x32xf32>, vector<8x32xf32> -> vector<8x32xf32>
    %28 = arith.addf %27, %19 : vector<8x32xf32>
    %cst_13 = arith.constant 0.000000e+00 : f32
    %29 = vector.broadcast %cst_13 : f32 to vector<8x32xf32>
    %30 = arith.maximumf %28, %29 : vector<8x32xf32>
    %31 = tpu.concatenate %25, %30 in 0 : vector<8x32xf32>, vector<8x32xf32> -> vector<16x32xf32>
    %c0_14 = arith.constant 0 : index
    %c0_15 = arith.constant 0 : index
    %32 = vector.load %arg4[%c0_14, %c0_15] : memref<32x32xf32, #tpu.memory_space<vmem>>, vector<32x32xf32>
    %c0_16 = arith.constant 0 : index
    %c0_17 = arith.constant 0 : index
    %33 = vector.load %arg5[%c0_16, %c0_17] : memref<8x32xf32, #tpu.memory_space<vmem>>, vector<8x32xf32>
    %cst_18 = arith.constant dense<0.000000e+00> : vector<16x32xf32>
    %34 = tpu.matmul %31, %32, %cst_18 {dimension_numbers = #tpu.dot_dimension_numbers<[1], [0], [0], [1], [0, 0, 1, 1], [], []>} : vector<16x32xf32>, vector<32x32xf32>, vector<16x32xf32> -> vector<16x32xf32>
    %35 = vector.extract_strided_slice %34 {offsets = [0, 0], sizes = [8, 32], strides = [1, 1]} : vector<16x32xf32> to vector<8x32xf32>
    %cst_19 = arith.constant dense<0.000000e+00> : vector<8x32xf32>
    %36 = tpu.matmul %16, %35, %cst_19 {dimension_numbers = #tpu.dot_dimension_numbers<[1], [0], [0], [1], [0, 0, 1, 1], [], []>} : vector<8x8xf32>, vector<8x32xf32>, vector<8x32xf32> -> vector<8x32xf32>
    %37 = arith.addf %36, %33 : vector<8x32xf32>
    %cst_20 = arith.constant 0.000000e+00 : f32
    %38 = vector.broadcast %cst_20 : f32 to vector<8x32xf32>
    %39 = arith.maximumf %37, %38 : vector<8x32xf32>
    %40 = vector.extract_strided_slice %34 {offsets = [8, 0], sizes = [8, 32], strides = [1, 1]} : vector<16x32xf32> to vector<8x32xf32>
    %cst_21 = arith.constant dense<0.000000e+00> : vector<8x32xf32>
    %41 = tpu.matmul %16, %40, %cst_21 {dimension_numbers = #tpu.dot_dimension_numbers<[1], [0], [0], [1], [0, 0, 1, 1], [], []>} : vector<8x8xf32>, vector<8x32xf32>, vector<8x32xf32> -> vector<8x32xf32>
    %42 = arith.addf %41, %33 : vector<8x32xf32>
    %cst_22 = arith.constant 0.000000e+00 : f32
    %43 = vector.broadcast %cst_22 : f32 to vector<8x32xf32>
    %44 = arith.maximumf %42, %43 : vector<8x32xf32>
    %45 = tpu.concatenate %39, %44 in 0 : vector<8x32xf32>, vector<8x32xf32> -> vector<16x32xf32>
    %c0_23 = arith.constant 0 : index
    %c0_24 = arith.constant 0 : index
    %46 = vector.load %arg6[%c0_23, %c0_24] : memref<32x32xf32, #tpu.memory_space<vmem>>, vector<32x32xf32>
    %c0_25 = arith.constant 0 : index
    %c0_26 = arith.constant 0 : index
    %47 = vector.load %arg7[%c0_25, %c0_26] : memref<8x32xf32, #tpu.memory_space<vmem>>, vector<8x32xf32>
    %cst_27 = arith.constant dense<0.000000e+00> : vector<16x32xf32>
    %48 = tpu.matmul %45, %46, %cst_27 {dimension_numbers = #tpu.dot_dimension_numbers<[1], [0], [0], [1], [0, 0, 1, 1], [], []>} : vector<16x32xf32>, vector<32x32xf32>, vector<16x32xf32> -> vector<16x32xf32>
    %49 = vector.extract_strided_slice %48 {offsets = [0, 0], sizes = [8, 32], strides = [1, 1]} : vector<16x32xf32> to vector<8x32xf32>
    %cst_28 = arith.constant dense<0.000000e+00> : vector<8x32xf32>
    %50 = tpu.matmul %16, %49, %cst_28 {dimension_numbers = #tpu.dot_dimension_numbers<[1], [0], [0], [1], [0, 0, 1, 1], [], []>} : vector<8x8xf32>, vector<8x32xf32>, vector<8x32xf32> -> vector<8x32xf32>
    %51 = arith.addf %50, %47 : vector<8x32xf32>
    %cst_29 = arith.constant 0.000000e+00 : f32
    %52 = vector.broadcast %cst_29 : f32 to vector<8x32xf32>
    %53 = arith.maximumf %51, %52 : vector<8x32xf32>
    %54 = vector.extract_strided_slice %48 {offsets = [8, 0], sizes = [8, 32], strides = [1, 1]} : vector<16x32xf32> to vector<8x32xf32>
    %cst_30 = arith.constant dense<0.000000e+00> : vector<8x32xf32>
    %55 = tpu.matmul %16, %54, %cst_30 {dimension_numbers = #tpu.dot_dimension_numbers<[1], [0], [0], [1], [0, 0, 1, 1], [], []>} : vector<8x8xf32>, vector<8x32xf32>, vector<8x32xf32> -> vector<8x32xf32>
    %56 = arith.addf %55, %47 : vector<8x32xf32>
    %cst_31 = arith.constant 0.000000e+00 : f32
    %57 = vector.broadcast %cst_31 : f32 to vector<8x32xf32>
    %58 = arith.maximumf %56, %57 : vector<8x32xf32>
    %59 = tpu.concatenate %53, %58 in 0 : vector<8x32xf32>, vector<8x32xf32> -> vector<16x32xf32>
    %c0_32 = arith.constant 0 : index
    %c0_33 = arith.constant 0 : index
    %60 = vector.load %arg8[%c0_32, %c0_33] : memref<4x256xf32, #tpu.memory_space<vmem>>, vector<4x256xf32>
    %c0_34 = arith.constant 0 : index
    %c0_35 = arith.constant 0 : index
    %61 = vector.load %arg9[%c0_34, %c0_35] : memref<1x4xf32, #tpu.memory_space<vmem>>, vector<1x4xf32>
    %62 = vector.extract_strided_slice %59 {offsets = [0, 0], sizes = [8, 32], strides = [1, 1]} : vector<16x32xf32> to vector<8x32xf32>
    %63 = vector.extract_strided_slice %62 {offsets = [0, 0], sizes = [1, 32], strides = [1, 1]} : vector<8x32xf32> to vector<1x32xf32>
    %64 = vector.extract_strided_slice %60 {offsets = [0, 0], sizes = [4, 32], strides = [1, 1]} : vector<4x256xf32> to vector<4x32xf32>
    %cst_36 = arith.constant dense<0.000000e+00> : vector<1x4xf32>
    %65 = tpu.matmul %63, %64, %cst_36 {dimension_numbers = #tpu.dot_dimension_numbers<[1], [1], [0], [0], [0, 0, 1, 0], [], []>} : vector<1x32xf32>, vector<4x32xf32>, vector<1x4xf32> -> vector<1x4xf32>
    %66 = arith.addf %61, %65 : vector<1x4xf32>
    %67 = vector.extract_strided_slice %62 {offsets = [1, 0], sizes = [1, 32], strides = [1, 1]} : vector<8x32xf32> to vector<1x32xf32>
    %68 = vector.extract_strided_slice %60 {offsets = [0, 32], sizes = [4, 32], strides = [1, 1]} : vector<4x256xf32> to vector<4x32xf32>
    %cst_37 = arith.constant dense<0.000000e+00> : vector<1x4xf32>
    %69 = tpu.matmul %67, %68, %cst_37 {dimension_numbers = #tpu.dot_dimension_numbers<[1], [1], [0], [0], [0, 0, 1, 0], [], []>} : vector<1x32xf32>, vector<4x32xf32>, vector<1x4xf32> -> vector<1x4xf32>
    %70 = arith.addf %66, %69 : vector<1x4xf32>
    %71 = vector.extract_strided_slice %62 {offsets = [2, 0], sizes = [1, 32], strides = [1, 1]} : vector<8x32xf32> to vector<1x32xf32>
    %72 = vector.extract_strided_slice %60 {offsets = [0, 64], sizes = [4, 32], strides = [1, 1]} : vector<4x256xf32> to vector<4x32xf32>
    %cst_38 = arith.constant dense<0.000000e+00> : vector<1x4xf32>
    %73 = tpu.matmul %71, %72, %cst_38 {dimension_numbers = #tpu.dot_dimension_numbers<[1], [1], [0], [0], [0, 0, 1, 0], [], []>} : vector<1x32xf32>, vector<4x32xf32>, vector<1x4xf32> -> vector<1x4xf32>
    %74 = arith.addf %70, %73 : vector<1x4xf32>
    %75 = vector.extract_strided_slice %62 {offsets = [3, 0], sizes = [1, 32], strides = [1, 1]} : vector<8x32xf32> to vector<1x32xf32>
    %76 = vector.extract_strided_slice %60 {offsets = [0, 96], sizes = [4, 32], strides = [1, 1]} : vector<4x256xf32> to vector<4x32xf32>
    %cst_39 = arith.constant dense<0.000000e+00> : vector<1x4xf32>
    %77 = tpu.matmul %75, %76, %cst_39 {dimension_numbers = #tpu.dot_dimension_numbers<[1], [1], [0], [0], [0, 0, 1, 0], [], []>} : vector<1x32xf32>, vector<4x32xf32>, vector<1x4xf32> -> vector<1x4xf32>
    %78 = arith.addf %74, %77 : vector<1x4xf32>
    %79 = vector.extract_strided_slice %62 {offsets = [4, 0], sizes = [1, 32], strides = [1, 1]} : vector<8x32xf32> to vector<1x32xf32>
    %80 = vector.extract_strided_slice %60 {offsets = [0, 128], sizes = [4, 32], strides = [1, 1]} : vector<4x256xf32> to vector<4x32xf32>
    %cst_40 = arith.constant dense<0.000000e+00> : vector<1x4xf32>
    %81 = tpu.matmul %79, %80, %cst_40 {dimension_numbers = #tpu.dot_dimension_numbers<[1], [1], [0], [0], [0, 0, 1, 0], [], []>} : vector<1x32xf32>, vector<4x32xf32>, vector<1x4xf32> -> vector<1x4xf32>
    %82 = arith.addf %78, %81 : vector<1x4xf32>
    %83 = vector.extract_strided_slice %62 {offsets = [5, 0], sizes = [1, 32], strides = [1, 1]} : vector<8x32xf32> to vector<1x32xf32>
    %84 = vector.extract_strided_slice %60 {offsets = [0, 160], sizes = [4, 32], strides = [1, 1]} : vector<4x256xf32> to vector<4x32xf32>
    %cst_41 = arith.constant dense<0.000000e+00> : vector<1x4xf32>
    %85 = tpu.matmul %83, %84, %cst_41 {dimension_numbers = #tpu.dot_dimension_numbers<[1], [1], [0], [0], [0, 0, 1, 0], [], []>} : vector<1x32xf32>, vector<4x32xf32>, vector<1x4xf32> -> vector<1x4xf32>
    %86 = arith.addf %82, %85 : vector<1x4xf32>
    %87 = vector.extract_strided_slice %62 {offsets = [6, 0], sizes = [1, 32], strides = [1, 1]} : vector<8x32xf32> to vector<1x32xf32>
    %88 = vector.extract_strided_slice %60 {offsets = [0, 192], sizes = [4, 32], strides = [1, 1]} : vector<4x256xf32> to vector<4x32xf32>
    %cst_42 = arith.constant dense<0.000000e+00> : vector<1x4xf32>
    %89 = tpu.matmul %87, %88, %cst_42 {dimension_numbers = #tpu.dot_dimension_numbers<[1], [1], [0], [0], [0, 0, 1, 0], [], []>} : vector<1x32xf32>, vector<4x32xf32>, vector<1x4xf32> -> vector<1x4xf32>
    %90 = arith.addf %86, %89 : vector<1x4xf32>
    %91 = vector.extract_strided_slice %62 {offsets = [7, 0], sizes = [1, 32], strides = [1, 1]} : vector<8x32xf32> to vector<1x32xf32>
    %92 = vector.extract_strided_slice %60 {offsets = [0, 224], sizes = [4, 32], strides = [1, 1]} : vector<4x256xf32> to vector<4x32xf32>
    %cst_43 = arith.constant dense<0.000000e+00> : vector<1x4xf32>
    %93 = tpu.matmul %91, %92, %cst_43 {dimension_numbers = #tpu.dot_dimension_numbers<[1], [1], [0], [0], [0, 0, 1, 0], [], []>} : vector<1x32xf32>, vector<4x32xf32>, vector<1x4xf32> -> vector<1x4xf32>
    %94 = arith.addf %90, %93 : vector<1x4xf32>
    %c0_44 = arith.constant 0 : index
    %c0_45 = arith.constant 0 : index
    %95 = vector.load %arg10[%c0_44, %c0_45] : memref<2x4xf32, #tpu.memory_space<vmem>>, vector<1x4xf32>
    tpu.vector_store %arg10[%c0_44, %c0_45], %94 {strides = array<i32>} : memref<2x4xf32, #tpu.memory_space<vmem>>, vector<1x4xf32>,
    %96 = vector.extract_strided_slice %59 {offsets = [8, 0], sizes = [8, 32], strides = [1, 1]} : vector<16x32xf32> to vector<8x32xf32>
    %97 = vector.extract_strided_slice %96 {offsets = [0, 0], sizes = [1, 32], strides = [1, 1]} : vector<8x32xf32> to vector<1x32xf32>
    %98 = vector.extract_strided_slice %60 {offsets = [0, 0], sizes = [4, 32], strides = [1, 1]} : vector<4x256xf32> to vector<4x32xf32>
    %cst_46 = arith.constant dense<0.000000e+00> : vector<1x4xf32>
    %99 = tpu.matmul %97, %98, %cst_46 {dimension_numbers = #tpu.dot_dimension_numbers<[1], [1], [0], [0], [0, 0, 1, 0], [], []>} : vector<1x32xf32>, vector<4x32xf32>, vector<1x4xf32> -> vector<1x4xf32>
    %100 = arith.addf %61, %99 : vector<1x4xf32>
    %101 = vector.extract_strided_slice %96 {offsets = [1, 0], sizes = [1, 32], strides = [1, 1]} : vector<8x32xf32> to vector<1x32xf32>
    %102 = vector.extract_strided_slice %60 {offsets = [0, 32], sizes = [4, 32], strides = [1, 1]} : vector<4x256xf32> to vector<4x32xf32>
    %cst_47 = arith.constant dense<0.000000e+00> : vector<1x4xf32>
    %103 = tpu.matmul %101, %102, %cst_47 {dimension_numbers = #tpu.dot_dimension_numbers<[1], [1], [0], [0], [0, 0, 1, 0], [], []>} : vector<1x32xf32>, vector<4x32xf32>, vector<1x4xf32> -> vector<1x4xf32>
    %104 = arith.addf %100, %103 : vector<1x4xf32>
    %105 = vector.extract_strided_slice %96 {offsets = [2, 0], sizes = [1, 32], strides = [1, 1]} : vector<8x32xf32> to vector<1x32xf32>
    %106 = vector.extract_strided_slice %60 {offsets = [0, 64], sizes = [4, 32], strides = [1, 1]} : vector<4x256xf32> to vector<4x32xf32>
    %cst_48 = arith.constant dense<0.000000e+00> : vector<1x4xf32>
    %107 = tpu.matmul %105, %106, %cst_48 {dimension_numbers = #tpu.dot_dimension_numbers<[1], [1], [0], [0], [0, 0, 1, 0], [], []>} : vector<1x32xf32>, vector<4x32xf32>, vector<1x4xf32> -> vector<1x4xf32>
    %108 = arith.addf %104, %107 : vector<1x4xf32>
    %109 = vector.extract_strided_slice %96 {offsets = [3, 0], sizes = [1, 32], strides = [1, 1]} : vector<8x32xf32> to vector<1x32xf32>
    %110 = vector.extract_strided_slice %60 {offsets = [0, 96], sizes = [4, 32], strides = [1, 1]} : vector<4x256xf32> to vector<4x32xf32>
    %cst_49 = arith.constant dense<0.000000e+00> : vector<1x4xf32>
    %111 = tpu.matmul %109, %110, %cst_49 {dimension_numbers = #tpu.dot_dimension_numbers<[1], [1], [0], [0], [0, 0, 1, 0], [], []>} : vector<1x32xf32>, vector<4x32xf32>, vector<1x4xf32> -> vector<1x4xf32>
    %112 = arith.addf %108, %111 : vector<1x4xf32>
    %113 = vector.extract_strided_slice %96 {offsets = [4, 0], sizes = [1, 32], strides = [1, 1]} : vector<8x32xf32> to vector<1x32xf32>
    %114 = vector.extract_strided_slice %60 {offsets = [0, 128], sizes = [4, 32], strides = [1, 1]} : vector<4x256xf32> to vector<4x32xf32>
    %cst_50 = arith.constant dense<0.000000e+00> : vector<1x4xf32>
    %115 = tpu.matmul %113, %114, %cst_50 {dimension_numbers = #tpu.dot_dimension_numbers<[1], [1], [0], [0], [0, 0, 1, 0], [], []>} : vector<1x32xf32>, vector<4x32xf32>, vector<1x4xf32> -> vector<1x4xf32>
    %116 = arith.addf %112, %115 : vector<1x4xf32>
    %117 = vector.extract_strided_slice %96 {offsets = [5, 0], sizes = [1, 32], strides = [1, 1]} : vector<8x32xf32> to vector<1x32xf32>
    %118 = vector.extract_strided_slice %60 {offsets = [0, 160], sizes = [4, 32], strides = [1, 1]} : vector<4x256xf32> to vector<4x32xf32>
    %cst_51 = arith.constant dense<0.000000e+00> : vector<1x4xf32>
    %119 = tpu.matmul %117, %118, %cst_51 {dimension_numbers = #tpu.dot_dimension_numbers<[1], [1], [0], [0], [0, 0, 1, 0], [], []>} : vector<1x32xf32>, vector<4x32xf32>, vector<1x4xf32> -> vector<1x4xf32>
    %120 = arith.addf %116, %119 : vector<1x4xf32>
    %121 = vector.extract_strided_slice %96 {offsets = [6, 0], sizes = [1, 32], strides = [1, 1]} : vector<8x32xf32> to vector<1x32xf32>
    %122 = vector.extract_strided_slice %60 {offsets = [0, 192], sizes = [4, 32], strides = [1, 1]} : vector<4x256xf32> to vector<4x32xf32>
    %cst_52 = arith.constant dense<0.000000e+00> : vector<1x4xf32>
    %123 = tpu.matmul %121, %122, %cst_52 {dimension_numbers = #tpu.dot_dimension_numbers<[1], [1], [0], [0], [0, 0, 1, 0], [], []>} : vector<1x32xf32>, vector<4x32xf32>, vector<1x4xf32> -> vector<1x4xf32>
    %124 = arith.addf %120, %123 : vector<1x4xf32>
    %125 = vector.extract_strided_slice %96 {offsets = [7, 0], sizes = [1, 32], strides = [1, 1]} : vector<8x32xf32> to vector<1x32xf32>
    %126 = vector.extract_strided_slice %60 {offsets = [0, 224], sizes = [4, 32], strides = [1, 1]} : vector<4x256xf32> to vector<4x32xf32>
    %cst_53 = arith.constant dense<0.000000e+00> : vector<1x4xf32>
    %127 = tpu.matmul %125, %126, %cst_53 {dimension_numbers = #tpu.dot_dimension_numbers<[1], [1], [0], [0], [0, 0, 1, 0], [], []>} : vector<1x32xf32>, vector<4x32xf32>, vector<1x4xf32> -> vector<1x4xf32>
    %128 = arith.addf %124, %127 : vector<1x4xf32>
    %c1 = arith.constant 1 : index
    %c0_54 = arith.constant 0 : index
    %129 = vector.load %arg10[%c1, %c0_54] : memref<2x4xf32, #tpu.memory_space<vmem>>, vector<1x4xf32>
    tpu.vector_store %arg10[%c1, %c0_54], %128 {strides = array<i32>} : memref<2x4xf32, #tpu.memory_space<vmem>>, vector<1x4xf32>,
    return
  }
}

</mosaic_0001>

<bundles_post_ra>
// kernel: tpu_custom_call.1
= control target key start
LH: loop header
LB: loop body
LE: loop exit
PB: predicated region body
PF: predicated region fallthrough
CT: control target
= control target key end

     0   :  { %15 = vsyncpa [#allocation3], 0  ;;  %s2947_s0 = inlined_call_operand.hbm [shape: f32[8,8], index: 0, kind: input, shape index: {}]   ;;  %s2948_s1 = inlined_call_operand.hbm [shape: f32[16,16], index: 1, kind: input, shape index: {}]   ;;  %s2949_s2 = inlined_call_operand.hbm [shape: f32[16,32], index: 2, kind: input, shape index: {}]   ;;  %s2950_s3 = inlined_call_operand.vmem [shape: f32[8,32], index: 3, kind: input, shape index: {}]   ;;  %s2951_s4 = inlined_call_operand.hbm [shape: f32[32,32], index: 4, kind: input, shape index: {}]   ;;  %s2952_s5 = inlined_call_operand.vmem [shape: f32[8,32], index: 5, kind: input, shape index: {}]   ;;  %s2953_s6 = inlined_call_operand.hbm [shape: f32[32,32], index: 6, kind: input, shape index: {}]   ;;  %s2954_s7 = inlined_call_operand.vmem [shape: f32[8,32], index: 7, kind: input, shape index: {}]   ;;  %s2955_s8 = inlined_call_operand.hbm [shape: f32[4,256], index: 8, kind: input, shape index: {}]   ;;  %s2956_s9 = inlined_call_operand.vmem [shape: f32[1,4], index: 9, kind: input, shape index: {}]   ;;  %s2957_s10 = inlined_call_operand.hbm [shape: f32[2,4], index: 10, kind: output, shape index: {}]  }
   0x1   :  { %16 = vsyncpa [#allocation6], 0 }
   0x2   :  { %17 = vsyncpa [#allocation9], 0 }
   0x3   :  { %18 = vsyncpa [#allocation12], 0 }
   0x4   :  { %19 = vsyncpa [#allocation4], 0  ;;  %s2619_s13 = smov [#allocation5]   ;;  %s2455_s17 = scalar_lea.hbm %s2948_s1, 256 }
   0x5   :  { %s35_s14 = sshll.u32 %s2619_s13, 4  ;;  %p2456_p0 = scmp.ne.s32.totalorder %s2948_s1, %s2455_s17  ;;  %s36_s14 = int_to_ptr.vmem [resolvable:$true] %s35_s14 }
   0x6   :  { %p2459_p1 = scmp.lt.u32.totalorder %s2455_s17, %s2948_s1 }
   0x8   :  { %p2461_p2 = pnand %p2459_p1, %p2456_p0 }
   0xa   :  { %2464 = shalt.err (!%p2461_p2)
}
   0xb   :  { %s2465_s22 = scalar_lea.vmem %s36_s14, 256  ;;  %p2470_p4 = scmp.lt.s32.totalorder %s36_s14, %s36_s14 }
   0xc   :  { %p2466_p3 = scmp.ne.s32.totalorder %s36_s14, %s2465_s22  ;;  %p2471_p5 = scmp.lt.s32.totalorder %s2465_s22, %s2465_s22 }
   0xe   :  { %p2472_p6 = por %p2471_p5, %p2470_p4 }
  0x10   :  { %p2473_p7 = pnand %p2472_p6, %p2466_p3 }
  0x12   :  { %2476 = shalt.err (!%p2473_p7)
}
  0x13   :  { %s2620_s23 = smov 128   ;;  %s2621_s24 = smov 8  }
  0x14   :  { %41 = dma.hbm_to_vmem [thread:$0]  %s2948_s1, 256, %s36_s14, [#allocation6], %s2620_s23, %s2620_s23, %s2621_s24  }
  0x15   :  { %s2622_s27 = smov [#allocation8]   ;;  %s2623_s29 = smov [#allocation2]  }
  0x16   :  { %s61_s28 = sshll.u32 %s2622_s27, 4  ;;  %s26_s30 = sshll.u32 %s2623_s29, 4  ;;  %s62_s28 = int_to_ptr.vmem [resolvable:$true] %s61_s28  ;;  %s27_s30 = int_to_ptr.vmem [resolvable:$true] %s26_s30 }
  0x17   :  { %s2477_s13 = scalar_lea.hbm %s2951_s4, 512 }
  0x18   :  { %p2478_p8 = scmp.ne.s32.totalorder %s2951_s4, %s2477_s13  ;;  %p2481_p9 = scmp.lt.u32.totalorder %s2477_s13, %s2951_s4 }
  0x1a   :  { %p2483_p10 = pnand %p2481_p9, %p2478_p8 }
  0x1c   :  { %2486 = shalt.err (!%p2483_p10)
}
  0x1d   :  { %s2487_s1 = scalar_lea.vmem %s62_s28, 512  ;;  %p2492_p12 = scmp.lt.s32.totalorder %s62_s28, %s62_s28 }
  0x1e   :  { %p2488_p11 = scmp.ne.s32.totalorder %s62_s28, %s2487_s1  ;;  %p2493_p13 = scmp.lt.s32.totalorder %s2487_s1, %s2487_s1 }
  0x20   :  { %p2494_p0 = por %p2493_p13, %p2492_p12 }
  0x22   :  { %p2495_p1 = pnand %p2494_p0, %p2488_p11 }
  0x24   :  { %2498 = shalt.err (!%p2495_p1)
}
  0x25   :  { %67 = dma.hbm_to_vmem [thread:$0]  %s2951_s4, 512, %s62_s28, [#allocation9], %s2620_s23, %s2620_s23, %s2621_s24  }
  0x26   :  { %s2499_s22 = scalar_lea.hbm %s2947_s0, 128 }
  0x27   :  { %p2500_p2 = scmp.ne.s32.totalorder %s2947_s0, %s2499_s22  ;;  %p2503_p3 = scmp.lt.u32.totalorder %s2499_s22, %s2947_s0 }
  0x29   :  { %p2505_p4 = pnand %p2503_p3, %p2500_p2 }
  0x2b   :  { %2508 = shalt.err (!%p2505_p4)
}
  0x2c   :  { %s2509_s11 = scalar_lea.vmem %s27_s30, 128  ;;  %p2514_p6 = scmp.lt.s32.totalorder %s27_s30, %s27_s30 }
  0x2d   :  { %p2510_p5 = scmp.ne.s32.totalorder %s27_s30, %s2509_s11  ;;  %p2515_p7 = scmp.lt.s32.totalorder %s2509_s11, %s2509_s11 }
  0x2f   :  { %p2516_p8 = por %p2515_p7, %p2514_p6 }
  0x31   :  { %p2517_p9 = pnand %p2516_p8, %p2510_p5 }
  0x33   :  { %2520 = shalt.err (!%p2517_p9)
}
  0x34   :  { %29 = dma.hbm_to_vmem [thread:$0]  %s2947_s0, 128, %s27_s30, [#allocation3]  }
  0x35   :  { %s2624_s12 = smov [#allocation7]   ;;  %s2625_s15 = smov [#allocation10]  }
  0x36   :  { %s47_s13 = sshll.u32 %s2624_s12, 4  ;;  %s75_s16 = sshll.u32 %s2625_s15, 4  ;;  %s48_s13 = int_to_ptr.vmem [resolvable:$true] %s47_s13  ;;  %s76_s16 = int_to_ptr.vmem [resolvable:$true] %s75_s16 }
  0x37   :  { %s2521_s1 = scalar_lea.hbm %s2949_s2, 256 }
  0x38   :  { %p2522_p10 = scmp.ne.s32.totalorder %s2949_s2, %s2521_s1  ;;  %p2525_p11 = scmp.lt.u32.totalorder %s2521_s1, %s2949_s2 }
  0x3a   :  { %p2527_p12 = pnand %p2525_p11, %p2522_p10 }
  0x3c   :  { %2530 = shalt.err (!%p2527_p12)
}
  0x3d   :  { %s2531_s0 = scalar_lea.vmem %s48_s13, 256  ;;  %p2536_p0 = scmp.lt.s32.totalorder %s48_s13, %s48_s13 }
  0x3e   :  { %p2532_p13 = scmp.ne.s32.totalorder %s48_s13, %s2531_s0  ;;  %p2537_p1 = scmp.lt.s32.totalorder %s2531_s0, %s2531_s0 }
  0x40   :  { %p2538_p2 = por %p2537_p1, %p2536_p0 }
  0x42   :  { %p2539_p3 = pnand %p2538_p2, %p2532_p13 }
  0x44   :  { %2542 = shalt.err (!%p2539_p3)
}
  0x45   :  { %53 = dma.hbm_to_vmem [thread:$0]  %s2949_s2, 256, %s48_s13, [#allocation6], %s2620_s23, %s2620_s23, %s2621_s24  }
  0x46   :  { %s2543_s27 = scalar_lea.hbm %s2953_s6, 512 }
  0x47   :  { %p2544_p4 = scmp.ne.s32.totalorder %s2953_s6, %s2543_s27  ;;  %p2547_p5 = scmp.lt.u32.totalorder %s2543_s27, %s2953_s6 }
  0x49   :  { %p2549_p6 = pnand %p2547_p5, %p2544_p4 }
  0x4b   :  { %2552 = shalt.err (!%p2549_p6)
}
  0x4c   :  { %s2553_s12 = scalar_lea.vmem %s76_s16, 512  ;;  %p2558_p8 = scmp.lt.s32.totalorder %s76_s16, %s76_s16 }
  0x4d   :  { %p2554_p7 = scmp.ne.s32.totalorder %s76_s16, %s2553_s12  ;;  %p2559_p9 = scmp.lt.s32.totalorder %s2553_s12, %s2553_s12 }
  0x4f   :  { %p2560_p10 = por %p2559_p9, %p2558_p8 }
  0x51   :  { %p2561_p11 = pnand %p2560_p10, %p2554_p7 }
  0x53   :  { %2564 = shalt.err (!%p2561_p11)
}
  0x54   :  { %81 = dma.hbm_to_vmem [thread:$0]  %s2953_s6, 512, %s76_s16, [#allocation9], %s2620_s23, %s2620_s23, %s2621_s24  }
  0x55   :  { %s2626_s15 = smov [#allocation11]   ;;  %s2565_s14 = scalar_lea.hbm %s2955_s8, 128 }
  0x56   :  { %s90_s17 = sshll.u32 %s2626_s15, 4  ;;  %p2566_p12 = scmp.ne.s32.totalorder %s2955_s8, %s2565_s14  ;;  %s91_s17 = int_to_ptr.vmem [resolvable:$true] %s90_s17 }
  0x57   :  { %p2569_p13 = scmp.lt.u32.totalorder %s2565_s14, %s2955_s8 }
  0x59   :  { %p2571_p0 = pnand %p2569_p13, %p2566_p12 }
  0x5b   :  { %2574 = shalt.err (!%p2571_p0)
}
  0x5c   :  { %s2575_s30 = scalar_lea.vmem %s91_s17, 128  ;;  %p2580_p2 = scmp.lt.s32.totalorder %s91_s17, %s91_s17 }
  0x5d   :  { %p2576_p1 = scmp.ne.s32.totalorder %s91_s17, %s2575_s30  ;;  %p2581_p3 = scmp.lt.s32.totalorder %s2575_s30, %s2575_s30 }
  0x5f   :  { %p2582_p4 = por %p2581_p3, %p2580_p2 }
  0x61   :  { %p2583_p5 = pnand %p2582_p4, %p2576_p1 }
  0x63   :  { %2586 = shalt.err (!%p2583_p5)
}
  0x64   :  { %93 = dma.hbm_to_vmem [thread:$0]  %s2955_s8, 128, %s91_s17, [#allocation12]  }
  0x65   :  { %2609 = dma.done.wait [#allocation3], 128  }
  0x66   :  { %2610 = vsyncadd [#allocation3], 4294967168 }
  0x67   :  { %2611 = dma.done.wait [#allocation6], 512  }
  0x68   :  { %2612 = vsyncadd [#allocation6], 4294966784 }
  0x69   :  { %2613 = dma.done.wait [#allocation9], 1024  }
  0x6a   :  { %2614 = vsyncadd [#allocation9], 4294966272 }
  0x6b   :  { %2615 = dma.done.wait [#allocation12], 128  }
  0x6c   :  { %2616 = vsyncadd [#allocation12], 4294967168  ;;  %v2627_v0 = vmov 0.0   ;;  %vm2628_vm0 = vmmov 0   ;;  %vm122_vm1 = vcmask 64512   ;;  %v114_v1 = vld [vmem:[#allocation2] sm:$0xff]  ;;  %v115_v7 = vlaneseq }
  0x6d   :  { %2242 = vmatprep.subr.mxu0 %v2627_v0  ;;  %2244 = vmatprep.mubr.msk.f32.mxu0 %vm2628_vm0, %v2627_v0  ;;  %v209_v2 = vld [vmem:[#allocation7] sm:$0xff]  ;;  %v210_v3 = vld [vmem:[#allocation7 + $0x8] sm:$0xff]  ;;  %v207_v4 = vld [vmem:[#allocation5] sm:$0xff]  ;;  %vm212_vm2 = vcmask 130048   ;;  %vm444_vm4 = vcmask 261120   ;;  %s2629_s22 = smov 96  }
  0x6e   :  { %2243 = vmatpush3.xpose.msk.msra.mxu0 %vm122_vm1, %v114_v1  ;;  %v2386_v5 = vpack.c.bf16 %v210_v3, %v209_v2  ;;  %2251 = vmatprep.mubr.msk.f32.mxu1 %vm212_vm2, %v207_v4  ;;  %v208_v6 = vld [vmem:[#allocation5 + $0x8] sm:$0xff]  ;;  %v116_v8 = vshrl.u32 %v115_v7, 7  ;;  %v118_v9 = vand.u32 127, %v115_v7  ;;  %v439_v22 = vld [vmem:[#allocation8] sm:$0xff]  ;;  %v441_v28 = vld [vmem:[#allocation8 + $0x10] sm:$0xff]  ;;  %s2631_s25 = smov 64  }
  0x6f   :  { %2254 = vmatprep.subr.mxu0 %v2627_v0  ;;  %v440_v23 = vld [vmem:[#allocation8 + $0x8] sm:$0xff]  ;;  %v442_v29 = vld [vmem:[#allocation8 + $0x18] sm:$0xff]  ;;  %v668_v42 = vld [vmem:[#allocation10] sm:$0xff]  ;;  %vm1520_vm5 = vcmask 24576   ;;  %s2632_s11 = smov [#allocation13]  }
  0x70   :  { %2387 = vmatprep.subr.bf16.mxu1 %v2386_v5  ;;  %vm119_vm3 = vcmp.eq.s32.totalorder %v116_v8, %v118_v9  ;;  %v2390_v24 = vpack.c.bf16 %v440_v23, %v439_v22  ;;  %v2394_v30 = vpack.c.bf16 %v442_v29, %v441_v28  ;;  %v211_v31 = vld [vmem:[%s2950_s3] sm:$0xff]  ;;  %v669_v43 = vld [vmem:[#allocation10 + $0x8] sm:$0xff]  ;;  %v670_v45 = vld [vmem:[#allocation10 + $0x10] sm:$0xff]  ;;  %s2121_s4 = sshll.u32 %s2632_s11, 4  ;;  %s2122_s4 = int_to_ptr.vmem [resolvable:$true] %s2121_s4 }
  0x71   :  { %2245 = vmatmul.mubr.msk.f32.vlgmr.msra.gmra.mrb[0].mxu0 %vm122_vm1, %v114_v1  ;;  %2389 = vmatpush3.bf16.msra.mxu1 %v2386_v5  ;;  %v2133_v10 = vsel %vm119_vm3, 1.0, %v2627_v0  ;;  %v2398_v44 = vpack.c.bf16 %v669_v43, %v668_v42  ;;  %v671_v46 = vld [vmem:[#allocation10 + $0x18] sm:$0xff]  ;;  %v896_v57 = vld [vmem:[#allocation11] sm:$0xff]  ;;  %s2587_s28 = scalar_lea.vmem %s2122_s4, 32  ;;  %p2592_p7 = scmp.lt.s32.totalorder %s2122_s4, %s2122_s4 }
  0x72   :  { %2256 = vmatprep.mubr.msk.f32.mxu0 %vm2628_vm0, %v2627_v0  ;;  %2259 = vmatprep.subr.mxu1 %v2627_v0  ;;  %v2402_v47 = vpack.c.bf16 %v671_v46, %v670_v45  ;;  %v443_v48 = vld [vmem:[%s2952_s5] sm:$0xff]  ;;  %s2630_s5 = smov 32   ;;  %v2820_v58 = vcombine.high %v896_v57, %v896_v57  ;;  %p2588_p6 = scmp.ne.s32.totalorder %s2122_s4, %s2587_s28 }
  0x73   :  { %976 = vrot.lane.b32.xlu1 %v896_v57, %s2629_s22  ;;  %v672_v61 = vld [vmem:[%s2954_s7] sm:$0xff]  ;;  %p2593_p8 = scmp.lt.s32.totalorder %s2587_s28, %s2587_s28 }
  0x74   :  { %2252 = vmatmul.mubr.msk.f32.vlgmr.msra.gmra.mrb[0].mxu1 %vm212_vm2, %v208_v6 }
  0x75   :  { %2261 = vmatprep.mubr.msk.f32.mxu1 %vm2628_vm0, %v2627_v0  ;;  %p2594_p9 = por %p2593_p8, %p2592_p7 }
  0x77   :  { %1054 = vrot.lane.b32.xlu1 %v896_v57, %s2631_s25  ;;  %p2595_p10 = pnand %p2594_p9, %p2588_p6 }
  0x7b   :  { %1287 = vrot.lane.b32.xlu1 %v2820_v58, %s2629_s22 }
  0x7f   :  { %1365 = vrot.lane.b32.xlu1 %v2820_v58, %s2631_s25 }
  0x83   :  { %1443 = vrot.lane.b32.xlu1 %v2820_v58, %s2630_s5 }
  0xe5   :  { %v977_v3 = vpop.permute.xlu1 %976 }
  0xe9   :  { %v1055_v9 = vpop.permute.xlu1 %1054 }
 0x144   :  { %v192_v11 = vpop.f32.mrb[0].mxu0 }
 0x145   :  { %v193_v12 = vadd.f32 %v2133_v10, %v192_v11  ;;  %v2246_v13 = vpop.f32.mrb[1].mxu0 }
 0x147   :  { %v196_v14 = vsel %vm122_vm1, %v193_v12, -inf  ;;  %v2253_v20 = vpop.f32.mrb[0].mxu1 }
 0x148   :  { %197 = vmax.xlane.f32.xlu0 %v196_v14  ;;  %v285_v21 = vpop.f32.mrb[1].mxu1  ;;  %2260 = vmatpush3.msra.mxu1 %v2253_v20 }
 0x149   :  { %2255 = vmatpush3.msra.mxu0 %v285_v21  ;;  %2275 = vmatprep.subr.mxu1 %v2627_v0 }
 0x14a   :  { %2391 = vmatprep.subr.bf16.mxu0 %v2390_v24 }
 0x1d5   :  { %v198_v15 = vpop.xlane.xlu0 %197 }
 0x1d6   :  { %v199_v16 = vsub.f32 %v193_v12, %v198_v15 }
 0x1d8   :  { %v200_v17 = vmul.f32 1.442695, %v199_v16 }
 0x1da   :  { %2451 = vpow2.f32 %v200_v17  ;;  %v1288_v17 = vpop.permute.xlu1 %1287 }
 0x1de   :  { %v1366_v20 = vpop.permute.xlu1 %1365 }
 0x1e2   :  { %v1444_v23 = vpop.permute.xlu1 %1443 }
 0x1e4   :  { %v2452_v18 = vpop.eup %2451 }
 0x1e5   :  { %v202_v19 = vsel %vm122_vm1, %v2452_v18, 0.0 }
 0x1e6   :  { %203 = vadd.xlane.f32.xlu0 %v202_v19 }
 0x1fc   :  { %1132 = vrot.lane.b32.xlu0 %v896_v57, %s2630_s5 }
 0x273   :  { %v204_v25 = vpop.xlane.xlu0 %203 }
 0x274   :  { %2453 = vrcp.f32 %v204_v25 }
 0x277   :  { %v1133_v12 = vpop.permute.xlu0 %1132 }
 0x27e   :  { %v2454_v26 = vpop.eup %2453 }
 0x27f   :  { %v2787_v27 = vmul.f32 %v2454_v26, %v2452_v18 }
 0x281   :  { %2257 = vmatmul.mubr.msk.f32.vlgmr.msra.gmra.mrb[2].mxu0 %vm122_vm1, %v2787_v27  ;;  %2262 = vmatmul.mubr.msk.f32.vlgmr.msra.gmra.mrb[2].mxu1 %vm122_vm1, %v2787_v27 }
 0x282   :  { %2393 = vmatpush3.bf16.msra.mxu0 %v2390_v24  ;;  %2277 = vmatprep.mubr.msk.f32.mxu1 %vm2628_vm0, %v2627_v0 }
 0x283   :  { %2395 = vmatprep.subr.bf16.mxu0 %v2394_v30 }
 0x286   :  { %2397 = vmatpush3.bf16.msra.mxu0 %v2394_v30 }
 0x287   :  { %2399 = vmatprep.subr.bf16.mxu0 %v2398_v44 }
 0x354   :  { %v363_v32 = vpop.f32.mrb[2].mxu0  ;;  %v434_v33 = vpop.f32.mrb[2].mxu1 }
 0x355   :  { %v364_v34 = vadd.f32 %v363_v32, %v211_v31  ;;  %v435_v35 = vadd.f32 %v434_v33, %v211_v31  ;;  %v2258_v36 = vpop.f32.mrb[3].mxu0  ;;  %v2263_v37 = vpop.f32.mrb[3].mxu1 }
 0x357   :  { %v367_v38 = vmax.f32 %v364_v34, 0.0  ;;  %v438_v39 = vmax.f32 %v435_v35, 0.0 }
 0x359   :  { %2272 = vmatprep.mubr.msk.f32.mxu0 %vm444_vm4, %v367_v38 }
 0x35a   :  { %2273 = vmatmul.mubr.msk.f32.vlgmr.msra.gmra.mrb[4].mxu0 %vm444_vm4, %v438_v39 }
 0x35b   :  { %2401 = vmatpush3.bf16.msra.mxu0 %v2398_v44 }
 0x35c   :  { %2403 = vmatprep.subr.bf16.mxu0 %v2402_v47 }
 0x35f   :  { %2405 = vmatpush3.bf16.msra.mxu0 %v2402_v47 }
 0x360   :  { %2306 = vmatprep.subr.mxu0 %v2627_v0 }
 0x42d   :  { %v2274_v40 = vpop.f32.mrb[4].mxu0 }
 0x42e   :  { %v517_v41 = vpop.f32.mrb[5].mxu0 }
 0x42f   :  { %2276 = vmatpush3.msra.mxu1 %v517_v41 }
 0x430   :  { %2278 = vmatmul.mubr.msk.f32.vlgmr.msra.gmra.mrb[4].mxu1 %vm122_vm1, %v2787_v27  ;;  %2280 = vmatprep.subr.mxu1 %v2627_v0 }
 0x431   :  { %2281 = vmatpush3.msra.mxu1 %v2274_v40  ;;  %2282 = vmatprep.mubr.msk.f32.mxu1 %vm2628_vm0, %v2627_v0 }
 0x432   :  { %2296 = vmatprep.subr.mxu1 %v2627_v0 }
 0x434   :  { %2283 = vmatmul.mubr.msk.f32.vlgmr.msra.gmra.mrb[6].mxu1 %vm122_vm1, %v2787_v27 }
 0x435   :  { %2298 = vmatprep.mubr.msk.f32.mxu1 %vm2628_vm0, %v2627_v0 }
 0x503   :  { %v592_v49 = vpop.f32.mrb[4].mxu1 }
 0x504   :  { %v593_v50 = vadd.f32 %v592_v49, %v443_v48  ;;  %v2279_v51 = vpop.f32.mrb[5].mxu1 }
 0x506   :  { %v596_v52 = vmax.f32 %v593_v50, 0.0 }
 0x507   :  { %v663_v53 = vpop.f32.mrb[6].mxu1 }
 0x508   :  { %v664_v54 = vadd.f32 %v663_v53, %v443_v48  ;;  %v2284_v55 = vpop.f32.mrb[7].mxu1  ;;  %2293 = vmatprep.mubr.msk.f32.mxu0 %vm444_vm4, %v596_v52 }
 0x50a   :  { %v667_v56 = vmax.f32 %v664_v54, 0.0 }
 0x50c   :  { %2294 = vmatmul.mubr.msk.f32.vlgmr.msra.gmra.mrb[6].mxu0 %vm444_vm4, %v667_v56 }
 0x50d   :  { %2308 = vmatprep.mubr.msk.f32.mxu0 %vm2628_vm0, %v2627_v0  ;;  %2307 = vmatpush3.xpose.msk.msra.mxu0 %vm444_vm4, %v896_v57 }
 0x50e   :  { %2311 = vmatprep.subr.mxu0 %v2627_v0 }
 0x5df   :  { %v2295_v59 = vpop.f32.mrb[6].mxu0 }
 0x5e0   :  { %v745_v60 = vpop.f32.mrb[7].mxu0 }
 0x5e1   :  { %2297 = vmatpush3.msra.mxu1 %v745_v60 }
 0x5e2   :  { %2299 = vmatmul.mubr.msk.f32.vlgmr.msra.gmra.mrb[8].mxu1 %vm122_vm1, %v2787_v27  ;;  %2301 = vmatprep.subr.mxu1 %v2627_v0 }
 0x5e3   :  { %2302 = vmatpush3.msra.mxu1 %v2295_v59  ;;  %2303 = vmatprep.mubr.msk.f32.mxu1 %vm2628_vm0, %v2627_v0 }
 0x5e4   :  { %2346 = vmatprep.subr.mxu1 %v2627_v0 }
 0x5e6   :  { %2304 = vmatmul.mubr.msk.f32.vlgmr.msra.gmra.mrb[10].mxu1 %vm122_vm1, %v2787_v27  ;;  %v897_v27 = vld [vmem:[%s2956_s9] sm:$0x1] }
 0x5e7   :  { %2348 = vmatprep.mubr.msk.f32.mxu1 %vm2628_vm0, %v2627_v0 }
 0x5ea   :  { %2347 = vmatpush3.xpose.msk.msra.mxu1 %vm444_vm4, %v896_v57 }
 0x5eb   :  { %2351 = vmatprep.subr.mxu1 %v2627_v0 }
 0x6b5   :  { %v820_v62 = vpop.f32.mrb[8].mxu1 }
 0x6b6   :  { %v821_v63 = vadd.f32 %v820_v62, %v672_v61  ;;  %v2300_v1 = vpop.f32.mrb[9].mxu1 }
 0x6b8   :  { %v2840_v2 = vmax.f32 %v821_v63, 0.0 }
 0x6b9   :  { %v891_v4 = vpop.f32.mrb[10].mxu1 }
 0x6ba   :  { %v892_v5 = vadd.f32 %v891_v4, %v672_v61  ;;  %v2305_v6 = vpop.f32.mrb[11].mxu1  ;;  %2309 = vmatmul.mubr.msk.f32.vlgmr.msra.gmra.mrb[8].mxu0 %vm444_vm4, %v2840_v2  ;;  %v975_v8 = vrot.slane %v2840_v2, 1  ;;  %v1053_v11 = vrot.slane %v2840_v2, 2  ;;  %v1131_v14 = vrot.slane %v2840_v2, 3 }
 0x6bb   :  { %2312 = vmatpush3.xpose.msk.msra.mxu0 %vm444_vm4, %v977_v3  ;;  %2313 = vmatprep.mubr.msk.f32.mxu0 %vm2628_vm0, %v2627_v0  ;;  %v1209_v16 = vrot.slane %v2840_v2, 4  ;;  %v1286_v19 = vrot.slane %v2840_v2, 5  ;;  %v1364_v22 = vrot.slane %v2840_v2, 6  ;;  %v1442_v25 = vrot.slane %v2840_v2, 7 }
 0x6bc   :  { %v2847_v7 = vmax.f32 %v892_v5, 0.0  ;;  %2316 = vmatprep.subr.mxu0 %v2627_v0 }
 0x6be   :  { %2349 = vmatmul.mubr.msk.f32.vlgmr.msra.gmra.mrb[12].mxu1 %vm444_vm4, %v2847_v7  ;;  %v1596_v10 = vrot.slane %v2847_v7, 1  ;;  %v1670_v13 = vrot.slane %v2847_v7, 2  ;;  %v1744_v15 = vrot.slane %v2847_v7, 3  ;;  %v1818_v18 = vrot.slane %v2847_v7, 4 }
 0x6bf   :  { %2352 = vmatpush3.xpose.msk.msra.mxu1 %vm444_vm4, %v977_v3  ;;  %2353 = vmatprep.mubr.msk.f32.mxu1 %vm2628_vm0, %v2627_v0  ;;  %v1892_v21 = vrot.slane %v2847_v7, 5  ;;  %v1966_v24 = vrot.slane %v2847_v7, 6  ;;  %v2040_v26 = vrot.slane %v2847_v7, 7 }
 0x6c0   :  { %2356 = vmatprep.subr.mxu1 %v2627_v0 }
 0x6c2   :  { %2314 = vmatmul.mubr.msk.f32.vlgmr.msra.gmra.mrb[8].mxu0 %vm444_vm4, %v975_v8 }
 0x6c3   :  { %2317 = vmatpush3.xpose.msk.msra.mxu0 %vm444_vm4, %v1055_v9  ;;  %2318 = vmatprep.mubr.msk.f32.mxu0 %vm2628_vm0, %v2627_v0 }
 0x6c4   :  { %2321 = vmatprep.subr.mxu0 %v2627_v0 }
 0x6c6   :  { %2354 = vmatmul.mubr.msk.f32.vlgmr.msra.gmra.mrb[12].mxu1 %vm444_vm4, %v1596_v10 }
 0x6c7   :  { %2357 = vmatpush3.xpose.msk.msra.mxu1 %vm444_vm4, %v1055_v9  ;;  %2358 = vmatprep.mubr.msk.f32.mxu1 %vm2628_vm0, %v2627_v0 }
 0x6c8   :  { %2361 = vmatprep.subr.mxu1 %v2627_v0 }
 0x6ca   :  { %2319 = vmatmul.mubr.msk.f32.vlgmr.msra.gmra.mrb[8].mxu0 %vm444_vm4, %v1053_v11 }
 0x6cb   :  { %2322 = vmatpush3.xpose.msk.msra.mxu0 %vm444_vm4, %v1133_v12  ;;  %2323 = vmatprep.mubr.msk.f32.mxu0 %vm2628_vm0, %v2627_v0 }
 0x6cc   :  { %2326 = vmatprep.subr.mxu0 %v2627_v0 }
 0x6ce   :  { %2359 = vmatmul.mubr.msk.f32.vlgmr.msra.gmra.mrb[12].mxu1 %vm444_vm4, %v1670_v13 }
 0x6cf   :  { %2362 = vmatpush3.xpose.msk.msra.mxu1 %vm444_vm4, %v1133_v12  ;;  %2363 = vmatprep.mubr.msk.f32.mxu1 %vm2628_vm0, %v2627_v0 }
 0x6d0   :  { %2366 = vmatprep.subr.mxu1 %v2627_v0 }
 0x6d2   :  { %2324 = vmatmul.mubr.msk.f32.vlgmr.msra.gmra.mrb[8].mxu0 %vm444_vm4, %v1131_v14 }
 0x6d3   :  { %2327 = vmatpush3.xpose.msk.msra.mxu0 %vm444_vm4, %v2820_v58  ;;  %2328 = vmatprep.mubr.msk.f32.mxu0 %vm2628_vm0, %v2627_v0 }
 0x6d4   :  { %2331 = vmatprep.subr.mxu0 %v2627_v0 }
 0x6d6   :  { %2364 = vmatmul.mubr.msk.f32.vlgmr.msra.gmra.mrb[12].mxu1 %vm444_vm4, %v1744_v15 }
 0x6d7   :  { %2367 = vmatpush3.xpose.msk.msra.mxu1 %vm444_vm4, %v2820_v58  ;;  %2368 = vmatprep.mubr.msk.f32.mxu1 %vm2628_vm0, %v2627_v0 }
 0x6d8   :  { %2371 = vmatprep.subr.mxu1 %v2627_v0 }
 0x6da   :  { %2329 = vmatmul.mubr.msk.f32.vlgmr.msra.gmra.mrb[8].mxu0 %vm444_vm4, %v1209_v16 }
 0x6db   :  { %2332 = vmatpush3.xpose.msk.msra.mxu0 %vm444_vm4, %v1288_v17  ;;  %2333 = vmatprep.mubr.msk.f32.mxu0 %vm2628_vm0, %v2627_v0 }
 0x6dc   :  { %2336 = vmatprep.subr.mxu0 %v2627_v0 }
 0x6de   :  { %2369 = vmatmul.mubr.msk.f32.vlgmr.msra.gmra.mrb[12].mxu1 %vm444_vm4, %v1818_v18 }
 0x6df   :  { %2372 = vmatpush3.xpose.msk.msra.mxu1 %vm444_vm4, %v1288_v17  ;;  %2373 = vmatprep.mubr.msk.f32.mxu1 %vm2628_vm0, %v2627_v0 }
 0x6e0   :  { %2376 = vmatprep.subr.mxu1 %v2627_v0 }
 0x6e2   :  { %2334 = vmatmul.mubr.msk.f32.vlgmr.msra.gmra.mrb[8].mxu0 %vm444_vm4, %v1286_v19 }
 0x6e3   :  { %2337 = vmatpush3.xpose.msk.msra.mxu0 %vm444_vm4, %v1366_v20  ;;  %2338 = vmatprep.mubr.msk.f32.mxu0 %vm2628_vm0, %v2627_v0 }
 0x6e4   :  { %2341 = vmatprep.subr.mxu0 %v2627_v0 }
 0x6e6   :  { %2374 = vmatmul.mubr.msk.f32.vlgmr.msra.gmra.mrb[12].mxu1 %vm444_vm4, %v1892_v21 }
 0x6e7   :  { %2377 = vmatpush3.xpose.msk.msra.mxu1 %vm444_vm4, %v1366_v20  ;;  %2378 = vmatprep.mubr.msk.f32.mxu1 %vm2628_vm0, %v2627_v0 }
 0x6e8   :  { %2381 = vmatprep.subr.mxu1 %v2627_v0 }
 0x6ea   :  { %2339 = vmatmul.mubr.msk.f32.vlgmr.msra.gmra.mrb[8].mxu0 %vm444_vm4, %v1364_v22 }
 0x6eb   :  { %2342 = vmatpush3.xpose.msk.msra.mxu0 %vm444_vm4, %v1444_v23  ;;  %2343 = vmatprep.mubr.msk.f32.mxu0 %vm2628_vm0, %v2627_v0 }
 0x6ee   :  { %2379 = vmatmul.mubr.msk.f32.vlgmr.msra.gmra.mrb[12].mxu1 %vm444_vm4, %v1966_v24 }
 0x6ef   :  { %2382 = vmatpush3.xpose.msk.msra.mxu1 %vm444_vm4, %v1444_v23  ;;  %2383 = vmatprep.mubr.msk.f32.mxu1 %vm2628_vm0, %v2627_v0 }
 0x6f2   :  { %2344 = vmatmul.mubr.msk.f32.vlgmr.msra.gmra.mrb[8].mxu0 %vm444_vm4, %v1442_v25 }
 0x6f6   :  { %2384 = vmatmul.mubr.msk.f32.vlgmr.msra.gmra.mrb[12].mxu1 %vm444_vm4, %v2040_v26 }
 0x7c5   :  { %v1515_v28 = vpop.f32.mrb[8].mxu0 }
 0x7c6   :  { %v2406_v29 = vadd.f32 %v1515_v28, %v897_v27  ;;  %v2345_v30 = vpop.f32.mrb[9].mxu0 }
 0x7c8   :  { %1521 = vst.msk [vmem:[#allocation13] sm:$0x1] %vm1520_vm5, %v2406_v29 }
 0x7c9   :  { %v2109_v0 = vpop.f32.mrb[12].mxu1 }
 0x7ca   :  { %v2407_v31 = vadd.f32 %v2109_v0, %v897_v27  ;;  %v2385_v32 = vpop.f32.mrb[13].mxu1 }
 0x7cc   :  { %2114 = vst.msk [vmem:[#allocation13 + $0x1] sm:$0x1] %vm1520_vm5, %v2407_v31 }
 0x7cd   :  { %2598 = shalt.err (!%p2595_p10)
}
 0x7ce   :  { %s2599_s2 = scalar_lea.hbm %s2957_s10, 32 }
 0x7cf   :  { %p2600_p11 = scmp.ne.s32.totalorder %s2957_s10, %s2599_s2  ;;  %p2603_p12 = scmp.lt.u32.totalorder %s2599_s2, %s2957_s10 }
 0x7d1   :  { %p2605_p13 = pnand %p2603_p12, %p2600_p11 }
 0x7d3   :  { %2608 = shalt.err (!%p2605_p13)
}
 0x7d4   :  { %2124 = dma.vmem_to_hbm [thread:$0]  %s2122_s4, 32, %s2957_s10, [#allocation4]  }
 0x7d5   :  { %2617 = dma.done.wait [#allocation4], 32  }
 0x7d6   :  { %2618 = vsyncadd [#allocation4], 4294967264 }
 0x7d7   :  { %2128 = vsyncpa [#allocation3], 1 }
 0x7d8   :  { %2129 = vsyncpa [#allocation6], 1 }
 0x7d9   :  { %2130 = vsyncpa [#allocation9], 1 }
 0x7da   :  { %2131 = vsyncpa [#allocation12], 1 }
 0x7db   :  { %2132 = vsyncpa [#allocation4], 1 }

</bundles_post_ra>
